<compile_context>
chip_gen: v5e
topology: v5e:2x2
jax: 0.10.0
libtpu: 0.0.40
codegen_flags: <defaults>
</compile_context>

<pallas_src>
from typing import List, Optional, Tuple

import jax
import jax.numpy as jnp
from jax.experimental import pallas as pl
from jax.experimental.pallas import tpu as pltpu


def _squeezed_shape(shape: Tuple[int, ...], axes: Optional[List[int]]) -> Tuple[int, ...]:
    """Replicates OnnxSqueezeStaticAxes.forward shape semantics."""
    if not axes:
        # torch.squeeze(x): drop every size-1 dim.
        return tuple(d for d in shape if d != 1)
    axes = sorted(axes, reverse=True)
    out = list(shape)
    for ax in axes:
        rank = len(out)
        a = ax if ax >= 0 else ax + rank
        if not (0 <= a < rank):
            # torch.squeeze(x, dim) raises for out-of-range dims.
            raise IndexError(f"squeeze axis {ax} out of range for rank {rank}")
        # torch.squeeze(x, dim) is a no-op if that dim is not 1.
        if out[a] == 1:
            del out[a]
    return tuple(out)


def _dma_copy_kernel(x_hbm, o_hbm, sem):
    # Single contiguous HBM->HBM DMA; no VMEM staging, no grid.
    cp = pltpu.make_async_copy(x_hbm, o_hbm, sem)
    cp.start()
    cp.wait()


def _pallas_hbm_copy(x2: jax.Array) -> jax.Array:
    itemsize = jnp.dtype(x2.dtype).itemsize
    total = x2.size
    return pl.pallas_call(
        _dma_copy_kernel,
        out_shape=jax.ShapeDtypeStruct(x2.shape, x2.dtype),
        in_specs=[pl.BlockSpec(memory_space=pl.ANY)],
        out_specs=pl.BlockSpec(memory_space=pl.ANY),
        scratch_shapes=[pltpu.SemaphoreType.DMA],
        cost_estimate=pl.CostEstimate(
            flops=0, transcendentals=0, bytes_accessed=2 * total * itemsize
        ),
    )(x2)


def onnx_squeeze_static_axes(x: jax.Array, axes: Optional[List[int]] = None) -> jax.Array:
    out_shape = _squeezed_shape(x.shape, axes)
    total = x.size
    if total == 0:
        # Nothing to copy; pure metadata change.
        return jnp.reshape(x, out_shape)

    # Present the contiguous buffer as a lane-dense 2D view for the DMA
    # descriptor: largest multiple-of-128 divisor of the element count
    # (capped at 8192), else a single row.  (For an HBM->HBM full-ref copy this
    # is descriptor plumbing only — no VMEM tiling/padding is involved.)
    cols = 0
    upper = min(8192, (total // 128) * 128)
    for cand in range(upper, 127, -128):
        if total % cand == 0:
            cols = cand
            break
    if cols == 0:
        view_shape = (1, total)
    else:
        view_shape = (total // cols, cols)

    x2 = jnp.reshape(x, view_shape)       # free (bitcast)
    y2 = _pallas_hbm_copy(x2)             # single HBM->HBM DMA
    return jnp.reshape(y2, out_shape)     # free (bitcast)


if __name__ == "__main__":
    key = jax.random.PRNGKey(0)
    # Input with a size-1 dim at axis 2; module configured with axes=[2].
    x = jax.random.normal(key, (2, 4, 1, 16, 16), dtype=jnp.float32)
    axes = [2]

    y = onnx_squeeze_static_axes(x, axes)
    y = jax.block_until_ready(y)

    # Reference check against plain-JAX squeeze semantics.
    y_ref = jnp.squeeze(x, axis=2)
    assert y.shape == (2, 4, 16, 16), y.shape
    assert y.dtype == x.dtype
    assert bool(jnp.array_equal(y, y_ref))

    # axes=None path (squeeze all size-1 dims); irregular element count.
    x2 = jax.random.normal(jax.random.PRNGKey(1), (1, 3, 1, 8), dtype=jnp.float32)
    y2 = jax.block_until_ready(onnx_squeeze_static_axes(x2, None))
    assert y2.shape == (3, 8)
    assert bool(jnp.array_equal(y2, jnp.squeeze(x2)))

    # Larger tensor, bf16 dtype, negative axis.
    x3 = jax.random.normal(jax.random.PRNGKey(2), (4, 1, 40, 384), dtype=jnp.bfloat16)
    y3 = jax.block_until_ready(onnx_squeeze_static_axes(x3, [-3]))
    assert y3.shape == (4, 40, 384)
    assert bool(jnp.array_equal(y3, jnp.squeeze(x3, axis=1)))

    # Axis that is not size-1 -> no-op on that dim (matches torch.squeeze semantics).
    x4 = jax.random.normal(jax.random.PRNGKey(3), (2, 1, 6, 1), dtype=jnp.float32)
    y4 = jax.block_until_ready(onnx_squeeze_static_axes(x4, [2, 3]))
    assert y4.shape == (2, 1, 6)
    assert bool(jnp.array_equal(y4, jnp.squeeze(x4, axis=3)))

    print("KERNEL_OK")
</pallas_src>

<mosaic_0001>
module attributes {stable_mosaic.version = 11 : i64} {
  func.func @_dma_copy_kernel(%arg0: memref<1x2048xf32, #tpu.memory_space<any>>, %arg1: memref<1x2048xf32, #tpu.memory_space<any>>, %arg2: memref<!tpu.dma_semaphore, #tpu.memory_space<semaphore_mem>>) attributes {dimension_semantics = [], scalar_prefetch = 0 : i64, scratch_operands = 1 : i64, tpu.core_type = #tpu.core_type<tc>} {
    tpu.enqueue_dma source(%arg0 : memref<1x2048xf32, #tpu.memory_space<any>>) target(%arg1 : memref<1x2048xf32, #tpu.memory_space<any>>) target_semaphore(%arg2 : memref<!tpu.dma_semaphore, #tpu.memory_space<semaphore_mem>>)
    tpu.wait_dma2 semaphore(%arg2 : memref<!tpu.dma_semaphore, #tpu.memory_space<semaphore_mem>>) src(%arg0 : memref<1x2048xf32, #tpu.memory_space<any>>) dst(%arg1 : memref<1x2048xf32, #tpu.memory_space<any>>)
    return
  }
}

</mosaic_0001>

<bundles_post_ra>
// kernel: tpu_custom_call.1
= control target key start
LH: loop header
LB: loop body
LE: loop exit
PB: predicated region body
PF: predicated region fallthrough
CT: control target
= control target key end

     0   :  { %s32_s12 = smov [#allocation2]   ;;  %s33_s13 = smov [#allocation3]   ;;  %s51_s0 = inlined_call_operand.hbm [shape: f32[1,2048], index: 0, kind: input, shape index: {}]   ;;  %s52_s1 = inlined_call_operand.hbm [shape: f32[1,2048], index: 1, kind: output, shape index: {}]  }
   0x1   :  { %s10_s8 = sshll.u32 %s51_s0, 4  ;;  %s12_s11 = sshll.u32 %s52_s1, 4  ;;  %s11_s8 = int_to_ptr.hbm [resolvable:$true] %s10_s8  ;;  %s13_s11 = int_to_ptr.hbm [resolvable:$true] %s12_s11 }
   0x2   :  { %s34_s14 = smov 0  }
   0x3   :  { %16 = dma.general %s11_s8, 256, %s13_s11, %s32_s12, %s33_s13, [#allocation4], %s34_s14, 0  }
   0x4   :  { %30 = dma.done.wait [#allocation2], 256 }
   0x5   :  { %31 = vsyncadd [#allocation2], 4294967040 }
   0x6   :  { %20 = vsyncmov [#allocation2] }
   0x9   :  { %s21_s15 = vpop.sfrf %20 }
   0xa   :  { %p26_p0 = scmp.ne.s32.totalorder %s21_s15, 0 }
   0xc   :  { %25 = shalt.err (%p26_p0)  }

</bundles_post_ra>
